<compile_context>
chip_gen: v5e
topology: v5e:2x2
jax: 0.10.0
libtpu: 0.0.40
codegen_flags: <defaults>
</compile_context>

<pallas_src>
import functools
import math

import jax
import jax.numpy as jnp
from jax.experimental import pallas as pl
from jax.experimental.pallas import tpu as pltpu


def _flash_attn_kernel(q_ref, k_ref, xv_ref, xq_ref, o_ref,
                       m_sc, l_sc, acc_sc, *, kv_resident, tk):
    """One (batch, q-tile) flash pass; grid axis 2 iterates kv tiles (innermost)."""
    kv = pl.program_id(2)

    q = q_ref[0]                                   # (Cq[+1], tq) bf16, fetched once per q tile
    if kv_resident:
        start = pl.multiple_of(kv * tk, 128)
        k = k_ref[0, :, pl.ds(start, tk)]          # (Cq[+1], tk) bf16, VMEM-resident slice
        xv = xv_ref[0, :, pl.ds(start, tk)]        # (C, tk) bf16
    else:
        k = k_ref[0]
        xv = xv_ref[0]

    # Scores with keys on the SUBLANE axis: s[m, n] = k[:, m] . q[:, n]  -> (tk, tq) f32.
    # Padded keys score ~ -1e30 automatically via the extra (ones, -1e30) row the wrapper
    # folded into Q/K, so no per-step masking is needed here.
    s = jax.lax.dot_general(k, q, (((0,), (0,)), ((), ())),
                            preferred_element_type=jnp.float32)

    tile_max = jnp.max(s, axis=0, keepdims=True)   # (1, tq), sublane reduce

    @pl.when(kv == 0)
    def _first():
        # First kv tile: write stats/accumulator directly (alpha would be exactly 0).
        m_sc[...] = tile_max
        p = jnp.exp(s - tile_max)
        l_sc[...] = jnp.sum(p, axis=0, keepdims=True)
        acc_sc[...] = jnp.dot(xv, p.astype(jnp.bfloat16),
                              preferred_element_type=jnp.float32)

    @pl.when(kv > 0)
    def _rest():
        m_prev = m_sc[...]
        m_new = jnp.maximum(m_prev, tile_max)
        alpha = jnp.exp(m_prev - m_new)                        # (1, tq)
        p = jnp.exp(s - m_new)                                 # (tk, tq) f32
        l_sc[...] = alpha * l_sc[...] + jnp.sum(p, axis=0, keepdims=True)
        acc_sc[...] = alpha * acc_sc[...] + jnp.dot(
            xv, p.astype(jnp.bfloat16), preferred_element_type=jnp.float32)
        m_sc[...] = m_new

    @pl.when(kv == pl.num_programs(2) - 1)
    def _finalize():
        inv_l = pl.reciprocal(l_sc[...], approx=True)          # (1, tq), EUP slot
        o_ref[0] = (acc_sc[...] * inv_l + xq_ref[0]).astype(o_ref.dtype)   # + residual


def self_attention_pallas(x_nchw, wq, bq, wk, bk, *,
                          block_q=None, block_kv=None, kv_resident=None):
    """x_nchw: (B, C, H, W). wq/wk: (Cq, C) 1x1-conv weights. bq/bk: (Cq,)."""
    B, C, H, W = x_nchw.shape
    N = H * W
    Cq = wq.shape[0]

    # ---- static tiling decisions -----------------------------------------------------
    n128 = 128 * ((N + 127) // 128)
    if block_q is None:
        block_q = min(256, n128)
    if block_kv is None:
        block_kv = min(512, n128)
    assert block_q % 128 == 0 and block_kv % 128 == 0
    # v7x has 2 TensorCores sharded over the parallel grid axes: keep B * num_q >= 2.
    while B * ((N + block_q - 1) // block_q) < 2 and block_q > 128:
        block_q //= 2
    step = math.lcm(block_q, block_kv)
    n_pad = step * ((N + step - 1) // step)
    num_q = n_pad // block_q
    num_kv = n_pad // block_kv
    pad = n_pad - N

    # kv-side streams stay VMEM-resident per batch element when they fit comfortably
    # (2 buffers x (K + values) in bf16), leaving headroom under the 48 MiB limit.
    if kv_resident is None:
        kv_resident = 2 * (C + Cq + 1) * n_pad * 2 <= 16 * 1024 * 1024

    # ---- wrapper-side projections (tiny: Cq = C // 32; 1/sqrt(N) folded into Q) -------
    x_bcn = x_nchw.reshape(B, C, N).astype(jnp.float32)
    scale = 1.0 / float(N) ** 0.5
    q = (jnp.einsum('oc,bcn->bon', wq.astype(jnp.float32), x_bcn) * scale
         + (bq.astype(jnp.float32) * scale)[None, :, None])                 # (B, Cq, N)
    k = (jnp.einsum('oc,bcn->bon', wk.astype(jnp.float32), x_bcn)
         + bk.astype(jnp.float32)[None, :, None])                           # (B, Cq, N)

    x_res = jnp.pad(x_bcn, ((0, 0), (0, 0), (0, pad))) if pad else x_bcn
    if pad:
        q = jnp.pad(q, ((0, 0), (0, 0), (0, pad)))
        k = jnp.pad(k, ((0, 0), (0, 0), (0, pad)))
        # Fold the padding mask into the score matmul: an extra ones-row on Q and a
        # (0 / -1e30) row on K makes padded keys score ~-1e30 with zero in-kernel cost.
        ones_row = jnp.ones((B, 1, n_pad), jnp.float32)
        mask_row = jnp.where(jnp.arange(n_pad) < N, 0.0, -1e30).astype(jnp.float32)
        mask_row = jnp.broadcast_to(mask_row[None, None, :], (B, 1, n_pad))
        q = jnp.concatenate([q, ones_row], axis=1)
        k = jnp.concatenate([k, mask_row], axis=1)
    cq_a = q.shape[1]

    q_b = q.astype(jnp.bfloat16)
    k_b = k.astype(jnp.bfloat16)
    x_val = x_res.astype(jnp.bfloat16)        # value stream in bf16 (halved HBM traffic)

    tq, tk = block_q, block_kv
    if kv_resident:
        k_spec = pl.BlockSpec((1, cq_a, n_pad), lambda b, qi, kv: (b, 0, 0))
        xv_spec = pl.BlockSpec((1, C, n_pad), lambda b, qi, kv: (b, 0, 0))
    else:
        k_spec = pl.BlockSpec((1, cq_a, tk), lambda b, qi, kv: (b, 0, kv))
        xv_spec = pl.BlockSpec((1, C, tk), lambda b, qi, kv: (b, 0, kv))

    kernel = functools.partial(_flash_attn_kernel, kv_resident=kv_resident, tk=tk)

    out_bcn = pl.pallas_call(
        kernel,
        out_shape=jax.ShapeDtypeStruct((B, C, n_pad), jnp.float32),
        grid_spec=pltpu.PrefetchScalarGridSpec(
            num_scalar_prefetch=0,
            grid=(B, num_q, num_kv),                        # kv reduction axis last
            in_specs=[
                pl.BlockSpec((1, cq_a, tq), lambda b, qi, kv: (b, 0, qi)),  # Q tile (bf16)
                k_spec,                                                     # K (bf16)
                xv_spec,                                                    # values x (bf16)
                pl.BlockSpec((1, C, tq), lambda b, qi, kv: (b, 0, qi)),     # residual x (f32)
            ],
            out_specs=pl.BlockSpec((1, C, tq), lambda b, qi, kv: (b, 0, qi)),
            scratch_shapes=[
                pltpu.VMEM((1, tq), jnp.float32),           # running max
                pltpu.VMEM((1, tq), jnp.float32),           # running sum
                pltpu.VMEM((C, tq), jnp.float32),           # output accumulator
            ],
        ),
        compiler_params=pltpu.CompilerParams(
            dimension_semantics=("parallel", "parallel", "arbitrary"),
            vmem_limit_bytes=48 * 1024 * 1024,              # v7x-safe (64 MiB physical)
        ),
    )(q_b, k_b, x_val, x_res)

    out = out_bcn[:, :, :N] if pad else out_bcn
    return out.reshape(B, C, H, W)


def self_attention_ref(x_nchw, wq, bq, wk, bk):
    """Pure-JAX reference matching the PyTorch forward semantics."""
    B, C, H, W = x_nchw.shape
    N = H * W
    x_flat = x_nchw.reshape(B, C, N).astype(jnp.float32)
    q = jnp.einsum('qc,bcn->bnq', wq, x_flat) + bq[None, None, :]     # (B, N, Cq)
    k = jnp.einsum('qc,bcn->bqn', wk, x_flat) + bk[None, :, None]     # (B, Cq, N)
    energy = jnp.einsum('bnq,bqm->bnm', q, k) / jnp.sqrt(jnp.float32(N))
    attn = jax.nn.softmax(energy, axis=-1)                            # (B, N, N)
    out = jnp.einsum('bnm,bcm->bnc', attn, x_flat)                    # (B, N, C)
    return jnp.transpose(out, (0, 2, 1)).reshape(B, C, H, W) + x_nchw


if __name__ == "__main__":
    key = jax.random.PRNGKey(0)

    def make_inputs(k, B, C, H, W):
        Cq = C // 32                                  # module requires in_dim // 32 >= 1
        kx, kwq, kbq, kwk, kbk = jax.random.split(k, 5)
        x = jax.random.normal(kx, (B, C, H, W), jnp.float32)
        bound = 1.0 / float(C) ** 0.5                 # kernel_size = 1 -> fan_in = C
        wq = jax.random.uniform(kwq, (Cq, C), jnp.float32, -bound, bound)
        bq = jax.random.uniform(kbq, (Cq,), jnp.float32, -bound, bound)
        wk = jax.random.uniform(kwk, (Cq, C), jnp.float32, -bound, bound)
        bk = jax.random.uniform(kbk, (Cq,), jnp.float32, -bound, bound)
        return x, wq, bq, wk, bk

    k1, k2 = jax.random.split(key)

    # Case 1: N = 192 (not a tile multiple) -> exercises padding (mask folded into Q/K),
    # a 2x2 (q, kv) flash loop per batch element, and the VMEM-resident kv path.
    x, wq, bq, wk, bk = make_inputs(k1, 2, 64, 16, 12)
    out = jax.block_until_ready(
        self_attention_pallas(x, wq, bq, wk, bk, block_q=128, block_kv=128))
    ref = jax.block_until_ready(self_attention_ref(x, wq, bq, wk, bk))
    assert out.shape == x.shape
    # bf16 MXU operands + approx EUP reciprocal -> loosened tolerance vs f32 reference.
    assert jnp.allclose(out, ref, atol=2e-2, rtol=2e-2), "case 1 mismatch vs reference"

    # Case 2: N = 256 (exact tiles, no padding), streamed (non-resident) kv path,
    # B = 1 so the tq-balance heuristic splits N into 2 q tiles.
    x, wq, bq, wk, bk = make_inputs(k2, 1, 64, 16, 16)
    out = jax.block_until_ready(
        self_attention_pallas(x, wq, bq, wk, bk, kv_resident=False))
    ref = jax.block_until_ready(self_attention_ref(x, wq, bq, wk, bk))
    assert out.shape == x.shape
    assert jnp.allclose(out, ref, atol=2e-2, rtol=2e-2), "case 2 mismatch vs reference"

    print("KERNEL_OK")
</pallas_src>

<mosaic_0001>
module attributes {stable_mosaic.version = 11 : i64} {
  func.func @_flash_attn_kernel(%arg0: i32, %arg1: i32, %arg2: i32, %arg3: memref<1x3x128xbf16, #tpu.memory_space<vmem>>, %arg4: memref<1x3x256xbf16, #tpu.memory_space<vmem>>, %arg5: memref<1x64x256xbf16, #tpu.memory_space<vmem>>, %arg6: memref<1x64x128xf32, #tpu.memory_space<vmem>>, %arg7: memref<1x64x128xf32, #tpu.memory_space<vmem>>, %arg8: memref<1x128xf32, #tpu.memory_space<vmem>>, %arg9: memref<1x128xf32, #tpu.memory_space<vmem>>, %arg10: memref<64x128xf32, #tpu.memory_space<vmem>>) attributes {dimension_semantics = [#tpu.dimension_semantics<parallel>, #tpu.dimension_semantics<parallel>, #tpu.dimension_semantics<arbitrary>], iteration_bounds = array<i64: 2, 2, 2>, scalar_prefetch = 0 : i64, scratch_operands = 3 : i64, tpu.core_type = #tpu.core_type<tc>, window_params = [{transform_indices = @transform_0, window_bounds = array<i64: 1, 3, 128>}, {transform_indices = @transform_1, window_bounds = array<i64: 1, 3, 256>}, {transform_indices = @transform_2, window_bounds = array<i64: 1, 64, 256>}, {transform_indices = @transform_3, window_bounds = array<i64: 1, 64, 128>}, {transform_indices = @transform_4, window_bounds = array<i64: 1, 64, 128>}]} {
    %c0 = arith.constant 0 : index
    %c0_0 = arith.constant 0 : index
    %c0_1 = arith.constant 0 : index
    %0 = vector.load %arg3[%c0, %c0_0, %c0_1] : memref<1x3x128xbf16, #tpu.memory_space<vmem>>, vector<1x3x128xbf16>
    %1 = vector.shape_cast %0 : vector<1x3x128xbf16> to vector<3x128xbf16>
    %c128_i32 = arith.constant 128 : i32
    %2 = arith.muli %arg2, %c128_i32 : i32
    %3 = tpu.assume_multiple %2, 128 : i32
    %c0_2 = arith.constant 0 : index
    %c0_3 = arith.constant 0 : index
    %4 = arith.index_cast %3 : i32 to index
    %5 = vector.load %arg4[%c0_2, %c0_3, %4] : memref<1x3x256xbf16, #tpu.memory_space<vmem>>, vector<1x3x128xbf16>
    %6 = vector.shape_cast %5 : vector<1x3x128xbf16> to vector<3x128xbf16>
    %c0_4 = arith.constant 0 : index
    %c0_5 = arith.constant 0 : index
    %7 = arith.index_cast %3 : i32 to index
    %8 = vector.load %arg5[%c0_4, %c0_5, %7] : memref<1x64x256xbf16, #tpu.memory_space<vmem>>, vector<1x64x128xbf16>
    %9 = vector.shape_cast %8 : vector<1x64x128xbf16> to vector<64x128xbf16>
    %cst = arith.constant dense<0.000000e+00> : vector<128x128xf32>
    %10 = tpu.matmul %6, %1, %cst {dimension_numbers = #tpu.dot_dimension_numbers<[0], [0], [1], [1], [0, 1, 1, 1], [], []>} : vector<3x128xbf16>, vector<3x128xbf16>, vector<128x128xf32> -> vector<128x128xf32>
    %cst_6 = arith.constant dense<0xFF800000> : vector<128xf32>
    %11 = vector.multi_reduction <maximumf>, %10, %cst_6 [0] : vector<128x128xf32> to vector<128xf32>
    %12 = vector.shape_cast %11 : vector<128xf32> to vector<1x128xf32>
    %c0_i32 = arith.constant 0 : i32
    %13 = arith.cmpi eq, %arg2, %c0_i32 : i32
    %14 = arith.extui %13 : i1 to i32
    %c0_i32_7 = arith.constant 0 : i32
    %15 = arith.cmpi ne, %14, %c0_i32_7 : i32
    scf.if %15 {
      %c0_11 = arith.constant 0 : index
      %c0_12 = arith.constant 0 : index
      %22 = vector.load %arg8[%c0_11, %c0_12] : memref<1x128xf32, #tpu.memory_space<vmem>>, vector<1x128xf32>
      tpu.vector_store %arg8[%c0_11, %c0_12], %12 {strides = array<i32>} : memref<1x128xf32, #tpu.memory_space<vmem>>, vector<1x128xf32>,
      %23 = vector.broadcast %12 : vector<1x128xf32> to vector<128x128xf32>
      %24 = arith.subf %10, %23 : vector<128x128xf32>
      %25 = math.exp %24 : vector<128x128xf32>
      %cst_13 = arith.constant dense<0.000000e+00> : vector<128xf32>
      %26 = vector.multi_reduction <add>, %25, %cst_13 [0] : vector<128x128xf32> to vector<128xf32>
      %27 = vector.shape_cast %26 : vector<128xf32> to vector<1x128xf32>
      %c0_14 = arith.constant 0 : index
      %c0_15 = arith.constant 0 : index
      %28 = vector.load %arg9[%c0_14, %c0_15] : memref<1x128xf32, #tpu.memory_space<vmem>>, vector<1x128xf32>
      tpu.vector_store %arg9[%c0_14, %c0_15], %27 {strides = array<i32>} : memref<1x128xf32, #tpu.memory_space<vmem>>, vector<1x128xf32>,
      %29 = arith.truncf %25 : vector<128x128xf32> to vector<128x128xbf16>
      %cst_16 = arith.constant dense<0.000000e+00> : vector<64x128xf32>
      %30 = tpu.matmul %9, %29, %cst_16 {dimension_numbers = #tpu.dot_dimension_numbers<[1], [0], [0], [1], [0, 0, 1, 1], [], []>} : vector<64x128xbf16>, vector<128x128xbf16>, vector<64x128xf32> -> vector<64x128xf32>
      %c0_17 = arith.constant 0 : index
      %c0_18 = arith.constant 0 : index
      %31 = vector.load %arg10[%c0_17, %c0_18] : memref<64x128xf32, #tpu.memory_space<vmem>>, vector<64x128xf32>
      tpu.vector_store %arg10[%c0_17, %c0_18], %30 {strides = array<i32>} : memref<64x128xf32, #tpu.memory_space<vmem>>, vector<64x128xf32>,
    } else {
    }
    %c0_i32_8 = arith.constant 0 : i32
    %16 = arith.cmpi sgt, %arg2, %c0_i32_8 : i32
    %17 = arith.extui %16 : i1 to i32
    %c0_i32_9 = arith.constant 0 : i32
    %18 = arith.cmpi ne, %17, %c0_i32_9 : i32
    scf.if %18 {
      %c0_11 = arith.constant 0 : index
      %c0_12 = arith.constant 0 : index
      %22 = vector.load %arg8[%c0_11, %c0_12] : memref<1x128xf32, #tpu.memory_space<vmem>>, vector<1x128xf32>
      %23 = arith.maximumf %22, %12 : vector<1x128xf32>
      %24 = arith.subf %22, %23 : vector<1x128xf32>
      %25 = math.exp %24 : vector<1x128xf32>
      %26 = vector.broadcast %23 : vector<1x128xf32> to vector<128x128xf32>
      %27 = arith.subf %10, %26 : vector<128x128xf32>
      %28 = math.exp %27 : vector<128x128xf32>
      %c0_13 = arith.constant 0 : index
      %c0_14 = arith.constant 0 : index
      %29 = vector.load %arg9[%c0_13, %c0_14] : memref<1x128xf32, #tpu.memory_space<vmem>>, vector<1x128xf32>
      %30 = arith.mulf %25, %29 : vector<1x128xf32>
      %cst_15 = arith.constant dense<0.000000e+00> : vector<128xf32>
      %31 = vector.multi_reduction <add>, %28, %cst_15 [0] : vector<128x128xf32> to vector<128xf32>
      %32 = vector.shape_cast %31 : vector<128xf32> to vector<1x128xf32>
      %33 = arith.addf %30, %32 : vector<1x128xf32>
      %c0_16 = arith.constant 0 : index
      %c0_17 = arith.constant 0 : index
      %34 = vector.load %arg9[%c0_16, %c0_17] : memref<1x128xf32, #tpu.memory_space<vmem>>, vector<1x128xf32>
      tpu.vector_store %arg9[%c0_16, %c0_17], %33 {strides = array<i32>} : memref<1x128xf32, #tpu.memory_space<vmem>>, vector<1x128xf32>,
      %c0_18 = arith.constant 0 : index
      %c0_19 = arith.constant 0 : index
      %35 = vector.load %arg10[%c0_18, %c0_19] : memref<64x128xf32, #tpu.memory_space<vmem>>, vector<64x128xf32>
      %36 = vector.broadcast %25 : vector<1x128xf32> to vector<64x128xf32>
      %37 = arith.mulf %36, %35 : vector<64x128xf32>
      %38 = arith.truncf %28 : vector<128x128xf32> to vector<128x128xbf16>
      %cst_20 = arith.constant dense<0.000000e+00> : vector<64x128xf32>
      %39 = tpu.matmul %9, %38, %cst_20 {dimension_numbers = #tpu.dot_dimension_numbers<[1], [0], [0], [1], [0, 0, 1, 1], [], []>} : vector<64x128xbf16>, vector<128x128xbf16>, vector<64x128xf32> -> vector<64x128xf32>
      %40 = arith.addf %37, %39 : vector<64x128xf32>
      %c0_21 = arith.constant 0 : index
      %c0_22 = arith.constant 0 : index
      %41 = vector.load %arg10[%c0_21, %c0_22] : memref<64x128xf32, #tpu.memory_space<vmem>>, vector<64x128xf32>
      tpu.vector_store %arg10[%c0_21, %c0_22], %40 {strides = array<i32>} : memref<64x128xf32, #tpu.memory_space<vmem>>, vector<64x128xf32>,
      %c0_23 = arith.constant 0 : index
      %c0_24 = arith.constant 0 : index
      %42 = vector.load %arg8[%c0_23, %c0_24] : memref<1x128xf32, #tpu.memory_space<vmem>>, vector<1x128xf32>
      tpu.vector_store %arg8[%c0_23, %c0_24], %23 {strides = array<i32>} : memref<1x128xf32, #tpu.memory_space<vmem>>, vector<1x128xf32>,
    } else {
    }
    %c1_i32 = arith.constant 1 : i32
    %19 = arith.cmpi eq, %arg2, %c1_i32 : i32
    %20 = arith.extui %19 : i1 to i32
    %c0_i32_10 = arith.constant 0 : i32
    %21 = arith.cmpi ne, %20, %c0_i32_10 : i32
    scf.if %21 {
      %c0_11 = arith.constant 0 : index
      %c0_12 = arith.constant 0 : index
      %22 = vector.load %arg9[%c0_11, %c0_12] : memref<1x128xf32, #tpu.memory_space<vmem>>, vector<1x128xf32>
      %23 = tpu.reciprocal %22 {approx = true} : vector<1x128xf32> -> vector<1x128xf32>
      %c0_13 = arith.constant 0 : index
      %c0_14 = arith.constant 0 : index
      %24 = vector.load %arg10[%c0_13, %c0_14] : memref<64x128xf32, #tpu.memory_space<vmem>>, vector<64x128xf32>
      %25 = vector.broadcast %23 : vector<1x128xf32> to vector<64x128xf32>
      %26 = arith.mulf %24, %25 : vector<64x128xf32>
      %c0_15 = arith.constant 0 : index
      %c0_16 = arith.constant 0 : index
      %c0_17 = arith.constant 0 : index
      %27 = vector.load %arg6[%c0_15, %c0_16, %c0_17] : memref<1x64x128xf32, #tpu.memory_space<vmem>>, vector<1x64x128xf32>
      %28 = vector.shape_cast %27 : vector<1x64x128xf32> to vector<64x128xf32>
      %29 = arith.addf %26, %28 : vector<64x128xf32>
      %c0_18 = arith.constant 0 : index
      %c0_19 = arith.constant 0 : index
      %c0_20 = arith.constant 0 : index
      %30 = vector.load %arg7[%c0_18, %c0_19, %c0_20] : memref<1x64x128xf32, #tpu.memory_space<vmem>>, vector<1x64x128xf32>
      %31 = vector.shape_cast %30 : vector<1x64x128xf32> to vector<64x128xf32>
      %32 = vector.shape_cast %29 : vector<64x128xf32> to vector<1x64x128xf32>
      tpu.vector_store %arg7[%c0_18, %c0_19, %c0_20], %32 {strides = array<i32>} : memref<1x64x128xf32, #tpu.memory_space<vmem>>, vector<1x64x128xf32>,
    } else {
    }
    return
  }
  func.func @transform_0(%arg0: i32, %arg1: i32, %arg2: i32) -> (i32, i32, i32) {
    %c0_i32 = arith.constant 0 : i32
    %c0_i32_0 = arith.constant 0 : i32
    return %arg0, %c0_i32, %arg1 : i32, i32, i32
  }
  func.func @transform_1(%arg0: i32, %arg1: i32, %arg2: i32) -> (i32, i32, i32) {
    %c0_i32 = arith.constant 0 : i32
    %c0_i32_0 = arith.constant 0 : i32
    %c0_i32_1 = arith.constant 0 : i32
    return %arg0, %c0_i32, %c0_i32_0 : i32, i32, i32
  }
  func.func @transform_2(%arg0: i32, %arg1: i32, %arg2: i32) -> (i32, i32, i32) {
    %c0_i32 = arith.constant 0 : i32
    %c0_i32_0 = arith.constant 0 : i32
    %c0_i32_1 = arith.constant 0 : i32
    return %arg0, %c0_i32, %c0_i32_0 : i32, i32, i32
  }
  func.func @transform_3(%arg0: i32, %arg1: i32, %arg2: i32) -> (i32, i32, i32) {
    %c0_i32 = arith.constant 0 : i32
    %c0_i32_0 = arith.constant 0 : i32
    return %arg0, %c0_i32, %arg1 : i32, i32, i32
  }
  func.func @transform_4(%arg0: i32, %arg1: i32, %arg2: i32) -> (i32, i32, i32) {
    %c0_i32 = arith.constant 0 : i32
    %c0_i32_0 = arith.constant 0 : i32
    return %arg0, %c0_i32, %arg1 : i32, i32, i32
  }
}

</mosaic_0001>

<bundles_post_ra>
// kernel: tpu_custom_call.1
= control target key start
LH: loop header
LB: loop body
LE: loop exit
PB: predicated region body
PF: predicated region fallthrough
CT: control target
= control target key end

     0   :  { %s2091_s0 = inlined_call_operand.vmem [shape: bf16[2,3,256], index: 0, kind: input, shape index: {}]   ;;  %s2092_s1 = inlined_call_operand.vmem [shape: bf16[2,3,256], index: 1, kind: input, shape index: {}]   ;;  %s2093_s2 = inlined_call_operand.hbm [shape: bf16[2,64,256], index: 2, kind: input, shape index: {}]   ;;  %s2094_s3 = inlined_call_operand.hbm [shape: f32[2,64,256], index: 3, kind: input, shape index: {}]   ;;  %s2095_s4 = inlined_call_operand.hbm [shape: f32[2,64,256], index: 4, kind: output, shape index: {}]  }
   0x1   :  { %2108 = sst [smem:[#allocation23_spill]] %s2091_s0 }
   0x2   :  { %2109 = sst [smem:[#allocation24_spill]] %s2092_s1 }
   0x3   :  { %2110 = sst [smem:[#allocation25_spill]] %s2093_s2 }
   0x4   :  { %2111 = sst [smem:[#allocation26_spill]] %s2095_s4 }
   0x5   :  { %9 = vsyncpa [#allocation6], 0 }
   0x6   :  { %11 = vsyncpa [#allocation6 + $0x1], 0 }
   0x7   :  { %12 = vsyncpa [#allocation9], 0 }
   0x8   :  { %14 = vsyncpa [#allocation9 + $0x1], 0 }
   0x9   :  { %15 = vsyncpa [#allocation7], 0 }
   0xa   :  { %17 = vsyncpa [#allocation7 + $0x1], 0  ;;  %s1579_s15 = smov 0   ;;  %s1581_s16 = smov 0  }
   0xb   :  { %s1583_s17 = smov 0   ;;  %s1585_s18 = smov 0  }
   0xc   :  { %s1587_s19 = smov 0   ;;  %s1589_s20 = smov 0  }
   0xd   :  { %s1591_s21 = smov 0   ;;  %s1593_s22 = smov 0  }
   0xe   :  { %s1595_s23 = smov 0   ;;  %s1597_s24 = smov 0  }
   0xf   :  { %s1599_s25 = smov 0   ;;  %s1601_s26 = smov 0  }
  0x10   :  { %s1603_s27 = smov 0  }
  0x11 LB: > { %2112 = sst [smem:[#allocation14_spill]] %s1497_s15  ;;  %s1014_s28 = sadd.s32 4294967295, %s1545_s27   ;;  %s1545_s27 = sphi %s1603_s27, %s23_s27   ;;  %s1541_s26 = sphi %s1601_s26, %s2160_s26   ;;  %s1537_s25 = sphi %s1599_s25, %s2159_s25   ;;  %s1533_s24 = sphi %s1597_s24, %s2148_s24   ;;  %s1529_s23 = sphi %s1595_s23, %s2158_s23   ;;  %s1525_s22 = sphi %s1593_s22, %s2157_s22   ;;  %s1521_s21 = sphi %s1591_s21, %s2147_s21   ;;  %s1517_s20 = sphi %s1589_s20, %s2156_s20   ;;  %s1513_s19 = sphi %s1587_s19, %s2155_s19   ;;  %s1509_s18 = sphi %s1585_s18, %s2154_s18   ;;  %s1505_s17 = sphi %s1583_s17, %s2153_s17   ;;  %s1501_s16 = sphi %s1581_s16, %s2152_s16   ;;  %s1497_s15 = sphi %s1579_s15, %s2151_s15  }
  0x12   : > { %2113 = sst [smem:[#allocation15_spill]] %s1521_s21  ;;  %s42_s29 = sadd.s32 1, %s1541_s26 }
  0x13   : > { %2114 = sst [smem:[#allocation16_spill]] %s1525_s22  ;;  %p110_p0 = scmp.ne.s32.totalorder %s1517_s20, %s1513_s19 }
  0x14   : > { %2115 = sst [smem:[#allocation17_spill]] %s1529_s23  ;;  %p111_p1 = scmp.eq.s32.totalorder %s1545_s27, 0 }
  0x15   : > { %2116 = sst [smem:[#allocation18_spill]] %s1533_s24  ;;  %p116_p2 = scmp.ne.s32.totalorder %s1513_s19, %s1509_s18 }
  0x16   : > { %p1651_p3 = scmp.eq.s32.totalorder %s1014_s28, 0  ;;  %p112_p4 = por %p111_p1, %p110_p0 }
  0x17   : > { %p1161_p5 = scmp.lt.s32.totalorder %s1545_s27, 8  ;;  %s215_s7 = sand.u32 1, %s1517_s20  }
  0x18   : > { %p1660_p6 = por %p1651_p3, %p116_p2  ;;  %s1018_s8 = sshll.u32 %s215_s7, 6 }
  0x19   : > { %s1083_s9 = sshll.u32 %s1541_s26, 6  ;;  %s2119_s2 = sld [smem:[#allocation25_spill]] }
  0x1a   : > { %s219_s13 = scalar_lea.vmem [#allocation5], %s1018_s8  ;;  %p1151_p7 = pnand %p1161_p5, %p112_p4 }
  0x1b   : > { %s227_s14 = sshll.u32 %s219_s13, 4  ;;  %p1024_p8 = scmp.ge.s32.totalorder %s1545_s27, 1  ;;  %s228_s14 = int_to_ptr.vmem [resolvable:$true] %s227_s14 }
  0x1c   : > { %s216_s30 = scalar_lea.sflag [#allocation6], %s215_s7  ;;  %s2096_s10 = smov 128  }
  0x1d   : > { %p258_p9 = scmp.lt.s32.totalorder %s1545_s27, 9  ;;  %s1015_s11 = sadd.s32 4294967294, %s1545_s27  }
  0x1e   : > { %s38_s7 = sadd.s32 1, %s1537_s25  ;;  %s131_s13 = sadd.s32 1, %s1505_s17 }
  0x1f   : > { %s224_s12 = scalar_lea.hbm %s2119_s2, %s1083_s9  ;;  %s2097_s9 = smov 8  }
  0x20   : > { %s225_s18 = sshll.u32 %s224_s12, 4  ;;  %p1676_p10 = pnand %p1024_p8, %p258_p9  ;;  %s226_s18 = int_to_ptr.hbm [resolvable:$true] %s225_s18 }
  0x21   : > { %1153 = dma.hbm_to_vmem [thread:$0]  (!%p1151_p7), %s226_s18, 1024, %s228_s14, %s216_s30, %s2096_s10, %s2096_s10, %s2097_s9  }
  0x22   : > { %s35_s12 = sadd.s32 1, %s1533_s24  ;;  %p138_p12 = scmp.ne.s32.totalorder %s1505_s17, %s1501_s16 }
  0x23   : > { %p36_p11 = scmp.ge.s32.totalorder %s35_s12, 2  ;;  %p144_p0 = scmp.ne.s32.totalorder %s1501_s16, %s1497_s15 }
  0x24   : > { %p1691_p13 = por %p138_p12, %p111_p1  ;;  %p170_p4 = scmp.eq.s32.totalorder %s1014_s28, 7 }
  0x25   : > { %s2162_s12 = smov (%p36_p11, %s35_s12), 0  ;;  %s2164_s7 = smov (!%p36_p11, %s38_s7), %s1537_s25 }
  0x26   : > { %2121 = sst [smem:[#allocation19_spill]] %s2162_s12  ;;  %p40_p2 = scmp.ge.s32.totalorder %s2164_s7, 2 }
  0x27   : > { %p1701_p7 = por %p144_p0, %p1651_p3  ;;  %p176_p8 = scmp.eq.s32.totalorder %s1015_s11, 7 }
  0x28   : > { %s2166_s7 = smov (%p40_p2, %s2164_s7), 0  ;;  %s2168_s29 = smov (!%p40_p2, %s42_s29), %s1541_s26 }
  0x29   : > { %2124 = sst [smem:[#allocation20_spill]] %s2166_s7  ;;  %s127_s18 = ssub.s32 %s1537_s25, %s2166_s7 }
  0x2a   : > { %p1712_p1 = por %p170_p4, %p138_p12  ;;  %p44_p9 = scmp.ge.s32.totalorder %s2168_s29, 2 }
  0x2b   : > { %p1716_p3 = por %p176_p8, %p144_p0  ;;  %s237_s5 = sand.u32 1, %s1505_s17  }
  0x2c   : > { %s2125_s10 = scalar_select %p1712_p1, 1, 0 }
  0x2d   : > { %s2127_s28 = scalar_select %p1716_p3, 1, 0 }
  0x2e   : > { %2126 = sst [smem:[#allocation21_spill]] %s2125_s10  ;;  %s1022_s11 = sshll.u32 %s1541_s26, 4 }
  0x2f   : > { %2128 = sst [smem:[#allocation22_spill]] %s2127_s28  ;;  %s2170_s29 = smov (%p44_p9, %s2168_s29), 0 }
  0x30   : > { %s1021_s9 = sshll.u32 %s237_s5, 6  ;;  %s100_s2 = ssub.s32 %s1541_s26, %s2170_s29 }
  0x31   : > { %p101_p11 = scmp.eq.s32.totalorder %s100_s2, 0  ;;  %s128_s7 = sor.u32 %s127_s18, %s100_s2 }
  0x32   : > { %p129_p12 = scmp.eq.s32.totalorder %s128_s7, 0  ;;  %s245_s12 = sadd.s32 %s1537_s25, %s1022_s11 }
  0x33   : > { %s2129_s24 = sadd.s32 1, %s1517_s20  ;;  %s1023_s10 = sshll.u32 %s245_s12, 3 }
  0x34   : > { %s1730_s15 = scalar_select %p101_p11, %s1517_s20, %s2129_s24  }
  0x35   : > { %s1733_s4 = scalar_select %p129_p12, %s1505_s17, %s131_s13  }
  0x36   : > { %s241_s28 = scalar_lea.vmem [#allocation8], %s1021_s9  ;;  %s247_s21 = scalar_lea.hbm %s2094_s3, %s1023_s10 }
  0x37   : > { %s250_s0 = sshll.u32 %s241_s28, 4  ;;  %s248_s23 = sshll.u32 %s247_s21, 4  ;;  %s251_s0 = int_to_ptr.vmem [resolvable:$true] %s250_s0  ;;  %s249_s23 = int_to_ptr.hbm [resolvable:$true] %s248_s23 }
  0x38   : > { %p1154_p0 = pnand %p1161_p5, %p1691_p13  ;;  %s238_s2 = scalar_lea.sflag [#allocation9], %s237_s5 }
  0x39   : > { %s1549_s7 = smov 256   ;;  %s2130_s18 = smov 8  }
  0x3a   : > { %s2131_s24 = smov 128   ;;  %262 = sbr.rel (%p1676_p10) target bundleno = 980 (0x3d4), region = 36 }
  0x3b   : > { %1156 = dma.hbm_to_vmem [thread:$0]  (!%p1154_p0), %s249_s23, 1024, %s251_s0, %s238_s2, %s1549_s7, %s2131_s24, %s2130_s18  }
  0x3c   : > { %s264_s9 = sand.u32 (!%p1676_p10), 1, %s1513_s19  }
  0x3d   : > { %s1025_s12 = sshll.u32 (!%p1676_p10), %s264_s9, 6  ;;  %s265_s1 = scalar_lea.sflag (!%p1676_p10), [#allocation6], %s264_s9 }
  0x3e   : > { %s268_s22 = scalar_lea.vmem (!%p1676_p10), [#allocation5], %s1025_s12 }
  0x3f   : > { %1484 = dma.done.wait (%p1660_p6), %s265_s1, 1024  }
  0x40   : > { %1486 = vsyncadd (%p1660_p6), %s265_s1, 4294966272  ;;  %s1752_s21 = sand.u32 1, %s1501_s16  }
  0x41   : > { %s1026_s0 = sshll.u32 %s1752_s21, 6  ;;  %s275_s23 = scalar_lea.sflag [#allocation9], %s1752_s21 }
  0x42   : > { %s1758_s10 = scalar_lea.vmem [#allocation8], %s1026_s0 }
  0x43   : > { %1488 = dma.done.wait (%p1701_p7), %s275_s23, 1024  }
  0x44   : > { %1490 = vsyncadd (%p1701_p7), %s275_s23, 4294966272  ;;  %s2132_s8 = sld [smem:[#allocation17_spill]]  ;;  %vm394_vm0 = vcmask 1040384   ;;  %vm395_vm1 = vcmask 1041408   ;;  %v1550_v18 = vmov 65535   ;;  %vm369_vm2 = vcmask 23552  }
  0x45   : > { %s2133_s6 = sld [smem:[#allocation15_spill]]  ;;  %v396_v19 = vsel %vm394_vm0, 4294967295, %v1550_v18 }
  0x46   : > { %s2134_s11 = sld [smem:[#allocation24_spill]]  ;;  %v397_v20 = vsel %vm395_vm1, %v396_v19, 0 }
  0x47   : > { %s2135_s12 = sld [smem:[#allocation16_spill]] }
  0x48   : > { %s2136_s28 = sld [smem:[#allocation23_spill]] }
  0x4a   : > { %p322_p5 = scmp.lt.s32.totalorder %s2132_s8, 1 }
  0x4b   : > { %s1032_s13 = sshll.u32 %s2133_s6, 7  ;;  %p1043_p10 = scmp.ne.s32.totalorder %s2133_s6, 0 }
  0x4c   : > { %s2172_s8 = smov (!%p322_p5, %s2132_s8), 1  ;;  %s338_s7 = sshra.s32 %s1032_s13, 7 }
  0x4d   : > { %s1084_s30 = sshll.u32 %s2172_s8, 2  ;;  %s1033_s18 = sshll.u32 %s338_s7, 1 }
  0x4e   : > { %s334_s2 = scalar_lea.vmem %s2134_s11, %s1084_s30  ;;  %s1034_s9 = sshll.u32 %s338_s7, 2 }
  0x4f   : > { %s341_s24 = scalar_lea.vmem %s334_s2, %s1033_s18  ;;  %s344_s14 = scalar_lea.vmem %s268_s22, %s1034_s9 [#allocation5] }
  0x50   : > { %v342_v0 = vld [vmem:[%s341_s24] sm:$0x3]  ;;  %v1777_v3 = vld [vmem:[%s344_s14 + $0x4] sm:$0xf0]  ;;  %v1781_v5 = vld [vmem:[%s344_s14 + $0x10] sm:$0xf] }
  0x51   : > { %v1773_v1 = vld [vmem:[%s344_s14] sm:$0xf]  ;;  %353 = vxpose.xlu0.c.b16.start.end [1/1] (short) %v342_v0, 128  ;;  %v1779_v4 = vld [vmem:[%s344_s14 + $0x4] sm:$0xf0]  ;;  %v1783_v6 = vld [vmem:[%s344_s14 + $0x10] sm:$0xf] }
  0x52   : > { %v1775_v2 = vld [vmem:[%s344_s14] sm:$0xf]  ;;  %v1785_v7 = vld [vmem:[%s344_s14 + $0x14] sm:$0xf0]  ;;  %v1793_v11 = vld [vmem:[%s344_s14 + $0x24] sm:$0xf0] }
  0x53   : > { %v1787_v8 = vld [vmem:[%s344_s14 + $0x14] sm:$0xf0]  ;;  %v1789_v9 = vld [vmem:[%s344_s14 + $0x20] sm:$0xf]  ;;  %v1795_v12 = vld [vmem:[%s344_s14 + $0x24] sm:$0xf0] }
  0x54   : > { %v1791_v10 = vld [vmem:[%s344_s14 + $0x20] sm:$0xf]  ;;  %v1797_v13 = vld [vmem:[%s344_s14 + $0x30] sm:$0xf]  ;;  %v1801_v15 = vld [vmem:[%s344_s14 + $0x34] sm:$0xf0] }
  0x55   : > { %v1799_v14 = vld [vmem:[%s344_s14 + $0x30] sm:$0xf]  ;;  %v1803_v16 = vld [vmem:[%s344_s14 + $0x34] sm:$0xf0]  ;;  %p324_p6 = scmp.lt.s32.totalorder %s2135_s12, 1  ;;  %s1028_s1 = sshll.u32 %s2172_s8, 1 }
  0x56   : > { %s1863_s8 = scalar_lea.vmem [#allocation10], %s1026_s0 }
  0x57   : > { %s2174_s12 = smov (!%p324_p6, %s2135_s12), 1 }
  0x58   : > { %s327_s22 = sadd.s32 %s1028_s1, %s2174_s12 }
  0x59   : > { %s1029_s23 = sshll.u32 %s327_s22, 1 }
  0x5a   : > { %s329_s5 = scalar_lea.vmem %s2136_s28, %s1029_s23 }
  0x5b   : > { %v336_v17 = vld [vmem:[%s329_s5] sm:$0x3] }
  0x5c   : > { %v399_v21 = vand.u32 %v397_v20, %v336_v17 }
  0x5e   : > { %408 = vmatpush.bf16.msra.mxu0 %v399_v21  ;;  %1093 = vmatpush.bf16.msra.mxu1 %v399_v21 }
  0x5f   : > { %1094 = vmatpush.bf16.msra.mxu2 %v399_v21  ;;  %1095 = vmatpush.bf16.msra.mxu3 %v399_v21 }
  0xfd   : > { %v361_v22 = vpop.trf.xlu0 }
  0xfe   : > { %1035 = vmatmul.msk.bf16.vlgmr.msra.gmra.mxu0 %vm369_vm2, %v361_v22 }
 0x10d   : > { %v362_v23 = vpop.trf.xlu0 }
 0x10e   : > { %1036 = vmatmul.msk.bf16.gmra.mxu0 %vm369_vm2, %v362_v23 }
 0x11d   : > { %v363_v24 = vpop.trf.xlu0 }
 0x11e   : > { %1037 = vmatmul.msk.bf16.vlgmr.msra.gmra.mxu1 %vm369_vm2, %v363_v24 }
 0x12d   : > { %v364_v25 = vpop.trf.xlu0 }
 0x12e   : > { %1038 = vmatmul.msk.bf16.gmra.mxu1 %vm369_vm2, %v364_v25 }
 0x13d   : > { %v365_v26 = vpop.trf.xlu0 }
 0x13e   : > { %1039 = vmatmul.msk.bf16.vlgmr.msra.gmra.mxu2 %vm369_vm2, %v365_v26 }
 0x14d   : > { %v366_v27 = vpop.trf.xlu0 }
 0x14e   : > { %1040 = vmatmul.msk.bf16.gmra.mxu2 %vm369_vm2, %v366_v27 }
 0x15d   : > { %v367_v28 = vpop.trf.xlu0 }
 0x15e   : > { %1041 = vmatmul.msk.bf16.vlgmr.msra.gmra.mxu3 %vm369_vm2, %v367_v28 }
 0x16d   : > { %v368_v29 = vpop.trf.xlu0 }
 0x16e   : > { %1042 = vmatmul.msk.bf16.gmra.mxu3 %vm369_vm2, %v368_v29 }
 0x17b   : > { %v1811_v30 = vpop.f32.mrf.mxu0 }
 0x183   : > { %v1817_v33 = vpop.f32.mrf.mxu0 }
 0x18b   : > { %v1825_v37 = vpop.f32.mrf.mxu0 }
 0x193   : > { %v1835_v42 = vpop.f32.mrf.mxu0 }
 0x19b   : > { %v1813_v31 = vpop.f32.mrf.mxu1 }
 0x19c   : > { %v450_v46 = vmax.f32 %v1811_v30, %v1813_v31 }
 0x1a3   : > { %v1819_v34 = vpop.f32.mrf.mxu1 }
 0x1a4   : > { %v451_v44 = vmax.f32 %v1817_v33, %v1819_v34 }
 0x1ab   : > { %v1827_v38 = vpop.f32.mrf.mxu1 }
 0x1ac   : > { %v452_v47 = vmax.f32 %v1825_v37, %v1827_v38 }
 0x1b3   : > { %v1837_v43 = vpop.f32.mrf.mxu1 }
 0x1b4   : > { %v453_v48 = vmax.f32 %v1835_v42, %v1837_v43 }
 0x1c1   : > { %v1815_v32 = vpop.f32.mrf.mxu2 }
 0x1c2   : > { %v454_v50 = vmax.f32 %v450_v46, %v1815_v32 }
 0x1c9   : > { %v1821_v35 = vpop.f32.mrf.mxu2 }
 0x1ca   : > { %v455_v49 = vmax.f32 %v451_v44, %v1821_v35 }
 0x1d1   : > { %v1831_v40 = vpop.f32.mrf.mxu2 }
 0x1d2   : > { %v456_v51 = vmax.f32 %v452_v47, %v1831_v40 }
 0x1d9   : > { %v1841_v45 = vpop.f32.mrf.mxu2 }
 0x1da   : > { %v457_v52 = vmax.f32 %v453_v48, %v1841_v45 }
 0x1e1   : > { %v1823_v36 = vpop.f32.mrf.mxu3 }
 0x1e2   : > { %v458_v55 = vmax.f32 %v454_v50, %v1823_v36 }
 0x1e9   : > { %v1829_v39 = vpop.f32.mrf.mxu3 }
 0x1ea   : > { %v459_v53 = vmax.f32 %v455_v49, %v1829_v39 }
 0x1ec   : > { %v462_v58 = vmax.f32 %v458_v55, %v459_v53 }
 0x1f1   : > { %v1833_v41 = vpop.f32.mrf.mxu3 }
 0x1f2   : > { %v460_v56 = vmax.f32 %v456_v51, %v1833_v41 }
 0x1f9   : > { %v1854_v54 = vpop.f32.mrf.mxu3 }
 0x1fa   : > { %v461_v57 = vmax.f32 %v457_v52, %v1854_v54 }
 0x1fc   : > { %v463_v59 = vmax.f32 %v460_v56, %v461_v57 }
 0x1fe   : > { %v464_v60 = vmax.f32 %v462_v58, %v463_v59 }
 0x200   : > { %v465_v61 = vrot.slane %v464_v60, 4 }
 0x202   : > { %v466_v62 = vmax.f32 %v464_v60, %v465_v61 }
 0x204   : > { %v467_v63 = vrot.slane %v466_v62, 2 }
 0x206   : > { %v468_v0 = vmax.f32 %v466_v62, %v467_v63  ;;  %474 = sbr.rel (%p1043_p10) target bundleno = 712 (0x2c8), region = 48 }
 0x208   : > { %v469_v17 = vrot.slane %v468_v0, 1 }
 0x20a   : > { %v1859_v18 = vmax.f32 %v468_v0, %v469_v17 }
 0x20c   : > { %475 = vst [vmem:[#allocation2] sm:$0x1] %v1859_v18  ;;  %v490_v19 = vsub.f32 %v1833_v41, %v1859_v18  ;;  %v491_v20 = vsub.f32 %v1854_v54, %v1859_v18  ;;  %v488_v21 = vsub.f32 %v1823_v36, %v1859_v18  ;;  %v489_v22 = vsub.f32 %v1829_v39, %v1859_v18 }
 0x20d   : > { %v486_v23 = vsub.f32 %v1831_v40, %v1859_v18  ;;  %v487_v24 = vsub.f32 %v1841_v45, %v1859_v18  ;;  %v484_v44 = vsub.f32 %v1815_v32, %v1859_v18  ;;  %v485_v47 = vsub.f32 %v1821_v35, %v1859_v18 }
 0x20e   : > { %v520_v25 = vmul.f32 1.442695, %v490_v19  ;;  %v522_v26 = vmul.f32 1.442695, %v491_v20  ;;  %v516_v27 = vmul.f32 1.442695, %v488_v21  ;;  %v482_v48 = vsub.f32 %v1827_v38, %v1859_v18 }
 0x20f   : > { %v518_v28 = vmul.f32 1.442695, %v489_v22  ;;  %v512_v29 = vmul.f32 1.442695, %v486_v23  ;;  %v514_v46 = vmul.f32 1.442695, %v487_v24  ;;  %v483_v50 = vsub.f32 %v1837_v43, %v1859_v18 }
 0x210   : > { %1275 = vpow2.f32 %v520_v25  ;;  %v508_v49 = vmul.f32 1.442695, %v484_v44  ;;  %v510_v51 = vmul.f32 1.442695, %v485_v47  ;;  %v480_v52 = vsub.f32 %v1813_v31, %v1859_v18 }
 0x211   : > { %1277 = vpow2.f32 %v522_v26  ;;  %v476_v55 = vsub.f32 %v1811_v30, %v1859_v18  ;;  %v504_v57 = vmul.f32 1.442695, %v482_v48  ;;  %v477_v58 = vsub.f32 %v1817_v33, %v1859_v18 }
 0x212   : > { %1279 = vpow2.f32 %v516_v27  ;;  %v506_v61 = vmul.f32 1.442695, %v483_v50  ;;  %v481_v62 = vsub.f32 %v1819_v34, %v1859_v18  ;;  %v500_v0 = vmul.f32 1.442695, %v480_v52 }
 0x213   : > { %1281 = vpow2.f32 %v518_v28  ;;  %v478_v17 = vsub.f32 %v1825_v37, %v1859_v18  ;;  %v492_v21 = vmul.f32 1.442695, %v476_v55  ;;  %v479_v23 = vsub.f32 %v1835_v42, %v1859_v18 }
 0x214   : > { %1283 = vpow2.f32 %v512_v29  ;;  %v494_v24 = vmul.f32 1.442695, %v477_v58  ;;  %v502_v25 = vmul.f32 1.442695, %v481_v62 }
 0x215   : > { %1285 = vpow2.f32 %v514_v46  ;;  %v496_v26 = vmul.f32 1.442695, %v478_v17  ;;  %v498_v44 = vmul.f32 1.442695, %v479_v23 }
 0x216   : > { %v1889_v53 = vpop.eup %1275  ;;  %1287 = vpow2.f32 %v508_v49 }
 0x217   : > { %v1893_v56 = vpop.eup %1277  ;;  %1289 = vpow2.f32 %v510_v51 }
 0x218   : > { %v1897_v59 = vpop.eup %1279  ;;  %v553_v60 = vpack.c.bf16 %v1893_v56, %v1889_v53  ;;  %1291 = vpow2.f32 %v504_v57 }
 0x219   : > { %v1903_v63 = vpop.eup %1281  ;;  %1293 = vpow2.f32 %v506_v61 }
 0x21a   : > { %v1907_v19 = vpop.eup %1283  ;;  %578 = vmatpush.bf16.msra.mxu0 %v553_v60  ;;  %1096 = vmatpush.bf16.msra.mxu1 %v553_v60  ;;  %v552_v20 = vpack.c.bf16 %v1903_v63, %v1897_v59  ;;  %1295 = vpow2.f32 %v500_v0 }
 0x21b   : > { %v1911_v22 = vpop.eup %1285  ;;  %1097 = vmatpush.bf16.msra.mxu2 %v553_v60  ;;  %1098 = vmatpush.bf16.msra.mxu3 %v553_v60  ;;  %1297 = vpow2.f32 %v492_v21 }
 0x21c   : > { %v1288_v27 = vpop.eup %1287  ;;  %v551_v28 = vpack.c.bf16 %v1911_v22, %v1907_v19  ;;  %1299 = vpow2.f32 %v494_v24 }
 0x21d   : > { %v1290_v29 = vpop.eup %1289  ;;  %1301 = vpow2.f32 %v502_v25 }
 0x21e   : > { %579 = vmatpush.bf16.msra.mxu0 %v552_v20  ;;  %1099 = vmatpush.bf16.msra.mxu1 %v552_v20  ;;  %v1292_v46 = vpop.eup %1291  ;;  %1303 = vpow2.f32 %v496_v26  ;;  %v550_v48 = vpack.c.bf16 %v1290_v29, %v1288_v27 }
 0x21f   : > { %1100 = vmatpush.bf16.msra.mxu2 %v552_v20  ;;  %1101 = vmatpush.bf16.msra.mxu3 %v552_v20  ;;  %v1294_v47 = vpop.eup %1293  ;;  %1305 = vpow2.f32 %v498_v44  ;;  %v1051_v44 = vor.u32 %v1787_v8, %v1783_v6 }
 0x220   : > { %v1296_v49 = vpop.eup %1295  ;;  %v549_v55 = vpack.c.bf16 %v1294_v47, %v1292_v46 }
 0x221   : > { %v1298_v50 = vpop.eup %1297 }
 0x222   : > { %580 = vmatpush.bf16.msra.mxu0 %v551_v28  ;;  %1102 = vmatpush.bf16.msra.mxu1 %v551_v28  ;;  %v1300_v51 = vpop.eup %1299 }
 0x223   : > { %1103 = vmatpush.bf16.msra.mxu2 %v551_v28  ;;  %1104 = vmatpush.bf16.msra.mxu3 %v551_v28  ;;  %v1302_v52 = vpop.eup %1301  ;;  %v524_v57 = vadd.f32 %v1300_v51, %v1298_v50  ;;  %v546_v25 = vpack.c.bf16 %v1300_v51, %v1298_v50  ;;  %v1047_v28 = vor.u32 %v1779_v4, %v1775_v2 }
 0x224   : > { %v1304_v58 = vpop.eup %1303  ;;  %v548_v62 = vpack.c.bf16 %v1302_v52, %v1296_v49 }
 0x225   : > { %v525_v60 = vadd.f32 %v1304_v58, %v524_v57  ;;  %v1306_v61 = vpop.eup %1305 }
 0x226   : > { %581 = vmatpush.bf16.msra.mxu0 %v550_v48  ;;  %1105 = vmatpush.bf16.msra.mxu1 %v550_v48  ;;  %v547_v20 = vpack.c.bf16 %v1306_v61, %v1304_v58 }
 0x227   : > { %1106 = vmatpush.bf16.msra.mxu2 %v550_v48  ;;  %1107 = vmatpush.bf16.msra.mxu3 %v550_v48  ;;  %v526_v0 = vadd.f32 %v1306_v61, %v525_v60 }
 0x229   : > { %v527_v17 = vadd.f32 %v1296_v49, %v526_v0  ;;  %v1055_v49 = vor.u32 %v1795_v12, %v1791_v10 }
 0x22a   : > { %582 = vmatpush.bf16.msra.mxu0 %v549_v55  ;;  %1108 = vmatpush.bf16.msra.mxu1 %v549_v55 }
 0x22b   : > { %1109 = vmatpush.bf16.msra.mxu2 %v549_v55  ;;  %1110 = vmatpush.bf16.msra.mxu3 %v549_v55  ;;  %v528_v21 = vadd.f32 %v1302_v52, %v527_v17 }
 0x22d   : > { %v529_v23 = vadd.f32 %v1292_v46, %v528_v21  ;;  %v1059_v46 = vor.u32 %v1803_v16, %v1799_v14 }
 0x22e   : > { %583 = vmatpush.bf16.msra.mxu0 %v548_v62  ;;  %1111 = vmatpush.bf16.msra.mxu1 %v548_v62 }
 0x22f   : > { %1112 = vmatpush.bf16.msra.mxu2 %v548_v62  ;;  %1113 = vmatpush.bf16.msra.mxu3 %v548_v62  ;;  %v530_v24 = vadd.f32 %v1294_v47, %v529_v23 }
 0x231   : > { %v531_v26 = vadd.f32 %v1288_v27, %v530_v24 }
 0x232   : > { %584 = vmatpush.bf16.msra.mxu0 %v547_v20  ;;  %1114 = vmatpush.bf16.msra.mxu1 %v547_v20 }
 0x233   : > { %1115 = vmatpush.bf16.msra.mxu2 %v547_v20  ;;  %1116 = vmatpush.bf16.msra.mxu3 %v547_v20  ;;  %v532_v48 = vadd.f32 %v1290_v29, %v531_v26 }
 0x235   : > { %v533_v47 = vadd.f32 %v1907_v19, %v532_v48 }
 0x236   : > { %585 = vmatpush.bf16.msra.mxu0 %v546_v25  ;;  %1117 = vmatpush.bf16.msra.mxu1 %v546_v25 }
 0x237   : > { %1118 = vmatpush.bf16.msra.mxu2 %v546_v25  ;;  %1119 = vmatpush.bf16.msra.mxu3 %v546_v25  ;;  %v534_v2 = vadd.f32 %v1911_v22, %v533_v47 }
 0x239   : > { %586 = vmatmul.bf16.vlgmr.msra.gmra.mxu0 %v1047_v28  ;;  %591 = vmatmul.bf16.vlgmr.msra.gmra.mxu1 %v1051_v44  ;;  %v535_v4 = vadd.f32 %v1897_v59, %v534_v2 }
 0x23a   : > { %596 = vmatmul.bf16.vlgmr.msra.gmra.mxu2 %v1055_v49  ;;  %601 = vmatmul.bf16.vlgmr.msra.gmra.mxu3 %v1059_v46 }
 0x23b   : > { %v536_v6 = vadd.f32 %v1903_v63, %v535_v4 }
 0x23d   : > { %v537_v8 = vadd.f32 %v1889_v53, %v536_v6 }
 0x23f   : > { %v538_v10 = vadd.f32 %v1893_v56, %v537_v8 }
 0x241   : > { %v539_v12 = vrot.slane %v538_v10, 4 }
 0x243   : > { %v540_v14 = vadd.f32 %v539_v12, %v538_v10 }
 0x245   : > { %v541_v16 = vrot.slane %v540_v14, 2 }
 0x247   : > { %v542_v27 = vadd.f32 %v541_v16, %v540_v14 }
 0x249   : > { %v543_v29 = vrot.slane %v542_v27, 1 }
 0x24b   : > { %v544_v19 = vadd.f32 %v543_v29, %v542_v27 }
 0x24d   : > { %545 = vst [vmem:[#allocation3] sm:$0x1] %v544_v19 }
 0x2b6   : > { %v587_v50 = vpop.f32.mrf.mxu0  ;;  %v592_v51 = vpop.f32.mrf.mxu1 }
 0x2b7   : > { %607 = vst [vmem:[#allocation4 + $0x30] sm:$0xff] %v587_v50 }
 0x2b8   : > { %609 = vst [vmem:[#allocation4 + $0x18] sm:$0xff] %v592_v51 }
 0x2bd   : > { %v597_v22 = vpop.f32.mrf.mxu2  ;;  %v602_v52 = vpop.f32.mrf.mxu3 }
 0x2be   : > { %611 = vst [vmem:[#allocation4 + $0x8] sm:$0xff] %v597_v22  ;;  %v589_v59 = vpop.f32.mrf.mxu0  ;;  %v594_v63 = vpop.f32.mrf.mxu1 }
 0x2bf   : > { %613 = vst [vmem:[#allocation4 + $0x28] sm:$0xff] %v602_v52 }
 0x2c0   : > { %608 = vst [vmem:[#allocation4] sm:$0xff] %v589_v59 }
 0x2c1   : > { %610 = vst [vmem:[#allocation4 + $0x10] sm:$0xff] %v594_v63 }
 0x2c5   : > { %v599_v53 = vpop.f32.mrf.mxu2  ;;  %v604_v56 = vpop.f32.mrf.mxu3 }
 0x2c6   : > { %612 = vst [vmem:[#allocation4 + $0x20] sm:$0xff] %v599_v53 }
 0x2c7   : > { %614 = vst [vmem:[#allocation4 + $0x38] sm:$0xff] %v604_v56 }
 0x2c8 PF: > { %s2137_s0 = sld [smem:[#allocation15_spill]] }
 0x2ce   : > { %p1060_p13 = scmp.le.s32.totalorder %s2137_s0, 0 }
 0x2d0   : > { %618 = sbr.rel (%p1060_p13) target bundleno = 920 (0x398), region = 52 }
 0x2d5   : > { %v1932_v55 = vld [vmem:[#allocation2] sm:$0x1] }
 0x2d6   : > { %v1936_v57 = vmax.f32 %v1932_v55, %v1859_v18 }
 0x2d8   : > { %v1939_v58 = vperm.slane %v1936_v57, 0  ;;  %796 = vst [vmem:[#allocation2] sm:$0x1] %v1936_v57 }
 0x2da   : > { %v641_v60 = vsub.f32 %v1833_v41, %v1939_v58  ;;  %v642_v61 = vsub.f32 %v1854_v54, %v1939_v58  ;;  %v639_v62 = vsub.f32 %v1823_v36, %v1939_v58  ;;  %v640_v0 = vsub.f32 %v1829_v39, %v1939_v58 }
 0x2db   : > { %v637_v18 = vsub.f32 %v1831_v40, %v1939_v58  ;;  %v638_v17 = vsub.f32 %v1841_v45, %v1939_v58  ;;  %v635_v54 = vsub.f32 %v1815_v32, %v1939_v58  ;;  %v636_v39 = vsub.f32 %v1821_v35, %v1939_v58 }
 0x2dc   : > { %v671_v20 = vmul.f32 1.442695, %v641_v60  ;;  %v673_v21 = vmul.f32 1.442695, %v642_v61  ;;  %v667_v23 = vmul.f32 1.442695, %v639_v62  ;;  %v633_v45 = vsub.f32 %v1827_v38, %v1939_v58 }
 0x2dd   : > { %v669_v24 = vmul.f32 1.442695, %v640_v0  ;;  %v663_v41 = vmul.f32 1.442695, %v637_v18  ;;  %v665_v36 = vmul.f32 1.442695, %v638_v17  ;;  %v634_v26 = vsub.f32 %v1837_v43, %v1939_v58 }
 0x2de   : > { %1307 = vpow2.f32 %v671_v20  ;;  %v659_v40 = vmul.f32 1.442695, %v635_v54  ;;  %v661_v25 = vmul.f32 1.442695, %v636_v39  ;;  %v631_v32 = vsub.f32 %v1813_v31, %v1939_v58 }
 0x2df   : > { %1309 = vpow2.f32 %v673_v21  ;;  %v627_v35 = vsub.f32 %v1811_v30, %v1939_v58  ;;  %v655_v49 = vmul.f32 1.442695, %v633_v45  ;;  %v628_v43 = vsub.f32 %v1817_v33, %v1939_v58 }
 0x2e0   : > { %1311 = vpow2.f32 %v667_v23  ;;  %v657_v47 = vmul.f32 1.442695, %v634_v26  ;;  %v632_v31 = vsub.f32 %v1819_v34, %v1939_v58  ;;  %v651_v4 = vmul.f32 1.442695, %v631_v32  ;;  %v675_v32 = vld [vmem:[#allocation3] sm:$0x1] }
 0x2e1   : > { %1313 = vpow2.f32 %v669_v24  ;;  %v629_v6 = vsub.f32 %v1825_v37, %v1939_v58  ;;  %v643_v33 = vmul.f32 1.442695, %v627_v35  ;;  %v630_v34 = vsub.f32 %v1835_v42, %v1939_v58 }
 0x2e2   : > { %1315 = vpow2.f32 %v663_v41  ;;  %v645_v10 = vmul.f32 1.442695, %v628_v43  ;;  %v653_v12 = vmul.f32 1.442695, %v632_v31  ;;  %v1064_v41 = vor.u32 %v1777_v3, %v1773_v1 }
 0x2e3   : > { %1317 = vpow2.f32 %v665_v36  ;;  %v647_v37 = vmul.f32 1.442695, %v629_v6  ;;  %v649_v29 = vmul.f32 1.442695, %v630_v34  ;;  %v1068_v54 = vor.u32 %v1785_v7, %v1781_v5  ;;  %v704_v6 = vld [vmem:[#allocation4 + $0x8] sm:$0xff]  ;;  %v703_v34 = vld [vmem:[#allocation4 + $0x10] sm:$0xff] }
 0x2e4   : > { %v1962_v28 = vpop.eup %1307  ;;  %1319 = vpow2.f32 %v659_v40  ;;  %v1072_v36 = vor.u32 %v1793_v11, %v1789_v9  ;;  %v1076_v39 = vor.u32 %v1801_v15, %v1797_v13  ;;  %v621_v5 = vsub.f32 %v1932_v55, %v1936_v57  ;;  %v700_v57 = vld [vmem:[#allocation4 + $0x30] sm:$0xff] }
 0x2e5   : > { %v1966_v44 = vpop.eup %1309  ;;  %1321 = vpow2.f32 %v661_v25 }
 0x2e6   : > { %v1970_v48 = vpop.eup %1311  ;;  %v726_v38 = vpack.c.bf16 %v1966_v44, %v1962_v28  ;;  %1323 = vpow2.f32 %v655_v49  ;;  %v622_v11 = vmul.f32 1.442695, %v621_v5 }
 0x2e7   : > { %v1976_v46 = vpop.eup %1313  ;;  %1325 = vpow2.f32 %v657_v47 }
 0x2e8   : > { %v1980_v2 = vpop.eup %1315  ;;  %751 = vmatpush.bf16.msra.mxu0 %v726_v38  ;;  %1120 = vmatpush.bf16.msra.mxu1 %v726_v38  ;;  %v725_v30 = vpack.c.bf16 %v1976_v46, %v1970_v48  ;;  %1327 = vpow2.f32 %v651_v4 }
 0x2e9   : > { %v1986_v8 = vpop.eup %1317  ;;  %1121 = vmatpush.bf16.msra.mxu2 %v726_v38  ;;  %1122 = vmatpush.bf16.msra.mxu3 %v726_v38  ;;  %1329 = vpow2.f32 %v643_v33  ;;  %v701_v33 = vld [vmem:[#allocation4] sm:$0xff] }
 0x2ea   : > { %v1320_v14 = vpop.eup %1319  ;;  %v724_v16 = vpack.c.bf16 %v1986_v8, %v1980_v2  ;;  %1331 = vpow2.f32 %v645_v10 }
 0x2eb   : > { %v1322_v27 = vpop.eup %1321  ;;  %1333 = vpow2.f32 %v653_v12 }
 0x2ec   : > { %752 = vmatpush.bf16.msra.mxu0 %v725_v30  ;;  %1123 = vmatpush.bf16.msra.mxu1 %v725_v30  ;;  %v1324_v19 = vpop.eup %1323  ;;  %v723_v42 = vpack.c.bf16 %v1322_v27, %v1320_v14  ;;  %1335 = vpow2.f32 %v647_v37 }
 0x2ed   : > { %1124 = vmatpush.bf16.msra.mxu2 %v725_v30  ;;  %1125 = vmatpush.bf16.msra.mxu3 %v725_v30  ;;  %v1326_v50 = vpop.eup %1325  ;;  %1337 = vpow2.f32 %v649_v29 }
 0x2ee   : > { %v1328_v51 = vpop.eup %1327  ;;  %v722_v59 = vpack.c.bf16 %v1326_v50, %v1324_v19  ;;  %1339 = vpow2.f32 %v622_v11 }
 0x2ef   : > { %v1330_v22 = vpop.eup %1329 }
 0x2f0   : > { %753 = vmatpush.bf16.msra.mxu0 %v724_v16  ;;  %1126 = vmatpush.bf16.msra.mxu1 %v724_v16  ;;  %v1332_v52 = vpop.eup %1331 }
 0x2f1   : > { %1127 = vmatpush.bf16.msra.mxu2 %v724_v16  ;;  %1128 = vmatpush.bf16.msra.mxu3 %v724_v16  ;;  %v1334_v63 = vpop.eup %1333  ;;  %v677_v53 = vadd.f32 %v1332_v52, %v1330_v22  ;;  %v719_v21 = vpack.c.bf16 %v1332_v52, %v1330_v22  ;;  %v705_v52 = vld [vmem:[#allocation4 + $0x20] sm:$0xff] }
 0x2f2   : > { %v1336_v56 = vpop.eup %1335  ;;  %v721_v61 = vpack.c.bf16 %v1334_v63, %v1328_v51 }
 0x2f3   : > { %v678_v58 = vadd.f32 %v1336_v56, %v677_v53  ;;  %v1338_v60 = vpop.eup %1337 }
 0x2f4   : > { %754 = vmatpush.bf16.msra.mxu0 %v723_v42  ;;  %1129 = vmatpush.bf16.msra.mxu1 %v723_v42  ;;  %v720_v18 = vpack.c.bf16 %v1338_v60, %v1336_v56  ;;  %v1340_v38 = vpop.eup %1339 }
 0x2f5   : > { %1130 = vmatpush.bf16.msra.mxu2 %v723_v42  ;;  %1131 = vmatpush.bf16.msra.mxu3 %v723_v42  ;;  %v679_v62 = vadd.f32 %v1338_v60, %v678_v58  ;;  %v676_v49 = vmul.f32 %v1340_v38, %v675_v32  ;;  %v709_v55 = vperm.slane %v1340_v38, 0 }
 0x2f7   : > { %v680_v0 = vadd.f32 %v1328_v51, %v679_v62  ;;  %v711_v31 = vmul.f32 %v709_v55, %v700_v57  ;;  %v715_v10 = vmul.f32 %v709_v55, %v704_v6  ;;  %v714_v16 = vmul.f32 %v709_v55, %v703_v34 }
 0x2f8   : > { %755 = vmatpush.bf16.msra.mxu0 %v722_v59  ;;  %1132 = vmatpush.bf16.msra.mxu1 %v722_v59 }
 0x2f9   : > { %1133 = vmatpush.bf16.msra.mxu2 %v722_v59  ;;  %1134 = vmatpush.bf16.msra.mxu3 %v722_v59  ;;  %v681_v17 = vadd.f32 %v1334_v63, %v680_v0  ;;  %v707_v59 = vld [vmem:[#allocation4 + $0x38] sm:$0xff]  ;;  %v716_v63 = vmul.f32 %v709_v55, %v705_v52 }
 0x2fa   : > { %v718_v53 = vmul.f32 %v709_v55, %v707_v59 }
 0x2fb   : > { %v682_v20 = vadd.f32 %v1324_v19, %v681_v17 }
 0x2fc   : > { %756 = vmatpush.bf16.msra.mxu0 %v721_v61  ;;  %1135 = vmatpush.bf16.msra.mxu1 %v721_v61 }
 0x2fd   : > { %1136 = vmatpush.bf16.msra.mxu2 %v721_v61  ;;  %1137 = vmatpush.bf16.msra.mxu3 %v721_v61  ;;  %v683_v23 = vadd.f32 %v1326_v50, %v682_v20 }
 0x2ff   : > { %v684_v24 = vadd.f32 %v1320_v14, %v683_v23  ;;  %v712_v14 = vmul.f32 %v709_v55, %v701_v33 }
 0x300   : > { %757 = vmatpush.bf16.msra.mxu0 %v720_v18  ;;  %1138 = vmatpush.bf16.msra.mxu1 %v720_v18 }
 0x301   : > { %1139 = vmatpush.bf16.msra.mxu2 %v720_v18  ;;  %1140 = vmatpush.bf16.msra.mxu3 %v720_v18  ;;  %v685_v40 = vadd.f32 %v1322_v27, %v684_v24 }
 0x303   : > { %v686_v45 = vadd.f32 %v1980_v2, %v685_v40 }
 0x304   : > { %758 = vmatpush.bf16.msra.mxu0 %v719_v21  ;;  %1141 = vmatpush.bf16.msra.mxu1 %v719_v21 }
 0x305   : > { %1142 = vmatpush.bf16.msra.mxu2 %v719_v21  ;;  %1143 = vmatpush.bf16.msra.mxu3 %v719_v21  ;;  %v687_v1 = vadd.f32 %v1986_v8, %v686_v45  ;;  %v706_v8 = vld [vmem:[#allocation4 + $0x28] sm:$0xff] }
 0x306   : > { %v717_v12 = vmul.f32 %v709_v55, %v706_v8 }
 0x307   : > { %759 = vmatmul.bf16.vlgmr.msra.gmra.mxu0 %v1064_v41  ;;  %764 = vmatmul.bf16.vlgmr.msra.gmra.mxu1 %v1068_v54  ;;  %v688_v3 = vadd.f32 %v1970_v48, %v687_v1 }
 0x308   : > { %769 = vmatmul.bf16.vlgmr.msra.gmra.mxu2 %v1072_v36  ;;  %774 = vmatmul.bf16.vlgmr.msra.gmra.mxu3 %v1076_v39 }
 0x309   : > { %v689_v7 = vadd.f32 %v1976_v46, %v688_v3  ;;  %v702_v46 = vld [vmem:[#allocation4 + $0x18] sm:$0xff] }
 0x30b   : > { %v690_v9 = vadd.f32 %v1962_v28, %v689_v7  ;;  %v713_v28 = vmul.f32 %v709_v55, %v702_v46 }
 0x30d   : > { %v691_v13 = vadd.f32 %v1966_v44, %v690_v9 }
 0x30f   : > { %v692_v15 = vrot.slane %v691_v13, 4 }
 0x311   : > { %v693_v25 = vadd.f32 %v692_v15, %v691_v13 }
 0x313   : > { %v694_v26 = vrot.slane %v693_v25, 2 }
 0x315   : > { %v695_v35 = vadd.f32 %v694_v26, %v693_v25 }
 0x317   : > { %v696_v43 = vrot.slane %v695_v35, 1 }
 0x319   : > { %v697_v48 = vadd.f32 %v696_v43, %v695_v35 }
 0x31b   : > { %v698_v47 = vadd.f32 %v697_v48, %v676_v49 }
 0x31d   : > { %699 = vst [vmem:[#allocation3] sm:$0x1] %v698_v47 }
 0x384   : > { %v760_v2 = vpop.f32.mrf.mxu0  ;;  %v765_v30 = vpop.f32.mrf.mxu1 }
 0x385   : > { %v780_v44 = vadd.f32 %v760_v2, %v711_v31  ;;  %v782_v4 = vadd.f32 %v765_v30, %v713_v28 }
 0x387   : > { %788 = vst [vmem:[#allocation4 + $0x30] sm:$0xff] %v780_v44 }
 0x388   : > { %790 = vst [vmem:[#allocation4 + $0x18] sm:$0xff] %v782_v4 }
 0x38b   : > { %v770_v37 = vpop.f32.mrf.mxu2  ;;  %v775_v27 = vpop.f32.mrf.mxu3 }
 0x38c   : > { %v784_v29 = vadd.f32 %v770_v37, %v715_v10  ;;  %v786_v19 = vadd.f32 %v775_v27, %v717_v12  ;;  %v762_v42 = vpop.f32.mrf.mxu0  ;;  %v767_v50 = vpop.f32.mrf.mxu1 }
 0x38d   : > { %v781_v51 = vadd.f32 %v762_v42, %v712_v14  ;;  %v783_v22 = vadd.f32 %v767_v50, %v714_v16 }
 0x38e   : > { %792 = vst [vmem:[#allocation4 + $0x8] sm:$0xff] %v784_v29 }
 0x38f   : > { %794 = vst [vmem:[#allocation4 + $0x28] sm:$0xff] %v786_v19 }
 0x390   : > { %789 = vst [vmem:[#allocation4] sm:$0xff] %v781_v51 }
 0x391   : > { %791 = vst [vmem:[#allocation4 + $0x10] sm:$0xff] %v783_v22 }
 0x393   : > { %v772_v56 = vpop.f32.mrf.mxu2  ;;  %v777_v58 = vpop.f32.mrf.mxu3 }
 0x394   : > { %v785_v60 = vadd.f32 %v772_v56, %v716_v63  ;;  %v787_v61 = vadd.f32 %v777_v58, %v718_v53 }
 0x396   : > { %793 = vst [vmem:[#allocation4 + $0x20] sm:$0xff] %v785_v60 }
 0x397   : > { %795 = vst [vmem:[#allocation4 + $0x38] sm:$0xff] %v787_v61 }
 0x398 PF: > { %s2138_s6 = sld [smem:[#allocation15_spill]] }
 0x39e   : > { %p1077_p2 = scmp.ne.s32.totalorder %s2138_s6, 1 }
 0x3a0   : > { %800 = sbr.rel (%p1077_p2) target bundleno = 955 (0x3bb), region = 56 }
 0x3a5   : > { %v801_v62 = vld [vmem:[#allocation3] sm:$0x1]  ;;  %v803_v0 = vld [vmem:[#allocation4 + $0x30] sm:$0xff]  ;;  %v804_v17 = vld [vmem:[#allocation4] sm:$0xff] }
 0x3a6   : > { %1341 = vrcp.f32 %v801_v62  ;;  %v805_v20 = vld [vmem:[#allocation4 + $0x18] sm:$0xff]  ;;  %v806_v21 = vld [vmem:[#allocation4 + $0x10] sm:$0xff]  ;;  %v822_v24 = vld [vmem:[%s1758_s10] sm:$0xff] }
 0x3a7   : > { %v807_v41 = vld [vmem:[#allocation4 + $0x8] sm:$0xff]  ;;  %v808_v54 = vld [vmem:[#allocation4 + $0x20] sm:$0xff]  ;;  %v824_v39 = vld [vmem:[%s1758_s10 + $0x10] sm:$0xff] }
 0x3a8   : > { %v823_v36 = vld [vmem:[%s1758_s10 + $0x8] sm:$0xff]  ;;  %v825_v7 = vld [vmem:[%s1758_s10 + $0x18] sm:$0xff]  ;;  %v826_v13 = vld [vmem:[%s1758_s10 + $0x20] sm:$0xff] }
 0x3a9   : > { %v809_v40 = vld [vmem:[#allocation4 + $0x28] sm:$0xff]  ;;  %v810_v9 = vld [vmem:[#allocation4 + $0x38] sm:$0xff]  ;;  %v828_v43 = vld [vmem:[%s1758_s10 + $0x30] sm:$0xff] }
 0x3aa   : > { %v827_v35 = vld [vmem:[%s1758_s10 + $0x28] sm:$0xff]  ;;  %v829_v55 = vld [vmem:[%s1758_s10 + $0x38] sm:$0xff] }
 0x3ac   : > { %v1342_v18 = vpop.eup %1341 }
 0x3ad   : > { %v812_v23 = vperm.slane %v1342_v18, 0 }
 0x3af   : > { %v814_v45 = vmul.f32 %v812_v23, %v803_v0  ;;  %v815_v1 = vmul.f32 %v812_v23, %v804_v17  ;;  %v816_v3 = vmul.f32 %v812_v23, %v805_v20  ;;  %v817_v5 = vmul.f32 %v812_v23, %v806_v21 }
 0x3b0   : > { %v818_v11 = vmul.f32 %v812_v23, %v807_v41  ;;  %v819_v15 = vmul.f32 %v812_v23, %v808_v54  ;;  %v820_v38 = vmul.f32 %v812_v23, %v809_v40  ;;  %v821_v48 = vmul.f32 %v812_v23, %v810_v9 }
 0x3b1   : > { %v830_v25 = vadd.f32 %v822_v24, %v814_v45  ;;  %v831_v26 = vadd.f32 %v823_v36, %v815_v1  ;;  %v832_v32 = vadd.f32 %v824_v39, %v816_v3  ;;  %v833_v49 = vadd.f32 %v825_v7, %v817_v5 }
 0x3b2   : > { %v834_v47 = vadd.f32 %v826_v13, %v818_v11  ;;  %v835_v57 = vadd.f32 %v827_v35, %v819_v15  ;;  %v836_v46 = vadd.f32 %v828_v43, %v820_v38  ;;  %v837_v31 = vadd.f32 %v829_v55, %v821_v48 }
 0x3b3   : > { %838 = vst [vmem:[%s1863_s8] sm:$0xff] %v830_v25 }
 0x3b4   : > { %839 = vst [vmem:[%s1863_s8 + $0x8] sm:$0xff] %v831_v26 }
 0x3b5   : > { %840 = vst [vmem:[%s1863_s8 + $0x10] sm:$0xff] %v832_v32 }
 0x3b6   : > { %841 = vst [vmem:[%s1863_s8 + $0x18] sm:$0xff] %v833_v49 }
 0x3b7   : > { %842 = vst [vmem:[%s1863_s8 + $0x20] sm:$0xff] %v834_v47 }
 0x3b8   : > { %843 = vst [vmem:[%s1863_s8 + $0x28] sm:$0xff] %v835_v57 }
 0x3b9   : > { %844 = vst [vmem:[%s1863_s8 + $0x30] sm:$0xff] %v836_v46 }
 0x3ba   : > { %845 = vst [vmem:[%s1863_s8 + $0x38] sm:$0xff] %v837_v31 }
 0x3bb PF: > { %s2139_s11 = sld [smem:[#allocation17_spill]]  ;;  %s860_s9 = sshll.u32 %s1863_s8, 4  ;;  %s861_s9 = int_to_ptr.vmem [resolvable:$true] %s860_s9 }
 0x3bc   : > { %s2140_s2 = sld [smem:[#allocation16_spill]]  ;;  %s847_s13 = scalar_lea.sflag [#allocation7], %s1752_s21 }
 0x3bd   : > { %s2142_s1 = sld [smem:[#allocation26_spill]] }
 0x3c1   : > { %s1079_s18 = sshll.u32 %s2139_s11, 4 }
 0x3c2   : > { %s857_s24 = sadd.s32 %s2140_s2, %s1079_s18 }
 0x3c3   : > { %s1080_s10 = sshll.u32 %s857_s24, 3  ;;  %s1423_s8 = scalar_lea.hbm %s2142_s1, 256 }
 0x3c4   : > { %s859_s22 = scalar_lea.hbm %s2142_s1, %s1080_s10 }
 0x3c5   : > { %s862_s23 = sshll.u32 %s859_s22, 4  ;;  %s863_s23 = int_to_ptr.hbm [resolvable:$true] %s862_s23 }
 0x3c6   : > { %s1417_s30 = sshra.s32 %s863_s23, 4  ;;  %s1418_s30 = int_to_ptr.hbm [resolvable:$true] %s1417_s30 }
 0x3c7   : > { %s1419_s28 = scalar_lea.hbm %s1418_s30, 64  ;;  %p1424_p9 = scmp.lt.s32.totalorder %s1418_s30, %s2142_s1 }
 0x3c8   : > { %p1420_p4 = scmp.ne.s32.totalorder %s1418_s30, %s1419_s28  ;;  %p1425_p11 = scmp.lt.s32.totalorder %s1423_s8, %s1419_s28 }
 0x3ca   : > { %p1421_p7 = pnand %p1420_p4, %p1712_p1  ;;  %p1426_p12 = por %p1425_p11, %p1424_p9 }
 0x3cc   : > { %p1422_p8 = pneg %p1421_p7 }
 0x3ce   : > { %p1427_p0 = pnand %p1426_p12, %p1422_p8 }
 0x3d0   : > { %1430 = shalt.err (!%p1427_p0)
}
 0x3d1   : > { %s1551_s21 = smov 128   ;;  %s1552_s2 = smov 256  }
 0x3d2   : > { %s1553_s18 = smov 8  }
 0x3d3   : > { %1148 = dma.vmem_to_hbm [thread:$0]  (%p1712_p1), %s861_s9, 1024, %s863_s23, %s847_s13, %s1551_s21, %s1552_s2, %s1553_s18  }
 0x3d4 PF: > { %s2143_s24 = sld [smem:[#allocation14_spill]]  ;;  %p1162_p5 = scmp.ge.s32.totalorder %s1545_s27, 2 }
 0x3d6   : > { %p1158_p6 = pnand %p1162_p5, %p1716_p3 }
 0x3d8   : > { %p1159_p10 = pneg %p1158_p6 }
 0x3da   : > { %s877_s14 = sand.u32 1, %s2143_s24  }
 0x3db   : > { %s878_s12 = scalar_lea.sflag [#allocation7], %s877_s14 }
 0x3dc   : > { %1492 = dma.done.wait (%p1159_p10), %s878_s12, 1024  }
 0x3dd   : > { %1494 = vsyncadd (%p1159_p10), %s878_s12, 4294966272  ;;  %s23_s27 = sadd.s32 1, %s1545_s27   ;;  %s2146_s7 = smov %s1730_s15 }
 0x3de   : > { %p2047_p13 = scmp.ge.s32.totalorder %s23_s27, 10   ;;  %s2147_s21 = sld [smem:[#allocation18_spill]] }
 0x3df   : > { %s2148_s24 = sld [smem:[#allocation19_spill]]  ;;  %s2151_s15 = smov %s1501_s16 }
 0x3e0   : > { %s2149_s9 = sld [smem:[#allocation20_spill]]  ;;  %s2152_s16 = smov %s1505_s17 }
 0x3e1   : > { %s2153_s17 = smov %s1733_s4  ;;  %s2154_s18 = smov %s1513_s19 }
 0x3e2   : > { %s2155_s19 = smov %s1517_s20  ;;  %s2156_s20 = smov %s2146_s7 }
 0x3e3   : > { %s2157_s22 = smov %s1537_s25  ;;  %s2158_s23 = smov %s1541_s26 }
 0x3e4   : > { %s2160_s26 = smov %s2170_s29  ;;  %22 = sbr.rel (!%p2047_p13) target bundleno = 17 (0x11), region = 114 }
 0x3e6   : > { %s2159_s25 = smov %s2149_s9 }
 0x3e9   :  { %884 = vsyncpa [#allocation6], 1 }
 0x3ea   :  { %886 = vsyncpa [#allocation6 + $0x1], 1 }
 0x3eb   :  { %887 = vsyncpa [#allocation9], 1 }
 0x3ec   :  { %889 = vsyncpa [#allocation9 + $0x1], 1 }
 0x3ed   :  { %890 = vsyncpa [#allocation7], 1 }
 0x3ee   :  { %892 = vsyncpa [#allocation7 + $0x1], 1 }

</bundles_post_ra>
